<compile_context>
chip_gen: v7x
topology: tpu7x:2x2x1
jax: 0.10.0
libtpu: 0.0.40
codegen_flags: <defaults>
</compile_context>

<pallas_src>
import functools

import jax
import jax.numpy as jnp
from jax import lax
from jax.experimental import pallas as pl
from jax.experimental.pallas import tpu as pltpu


def rnn_recurrence_kernel(p_ref, h0_ref, whh_t_ref, hseq_ref, h_scr):
    """Processes one block of T_BLK timesteps of the recurrence.

    p_ref     : (T_BLK, B, H)  precomputed x_t @ W_xh^T + b_xh + b_hh
    h0_ref    : (1, B, H)      initial hidden state
    whh_t_ref : (H, H)         W_hh transposed (so kernel does h @ W_hh^T)
    hseq_ref  : (T_BLK, B, H)  hidden states for this block (output)
    h_scr     : (B, H) f32     hidden state carried across grid steps
    """
    blk = pl.program_id(0)

    # Initialize the carried hidden state from h0 on the first block only.
    @pl.when(blk == 0)
    def _():
        h_scr[...] = h0_ref[0].astype(jnp.float32)

    whh_t = whh_t_ref[...]            # load once per block, reused every step
    n_steps = p_ref.shape[0]          # static T_BLK

    def step(t, h):
        pre = jnp.dot(h, whh_t, preferred_element_type=jnp.float32) + p_ref[t]
        h_new = jnp.tanh(pre)
        hseq_ref[t] = h_new.astype(hseq_ref.dtype)
        return h_new

    # Unrolled so the LLO scheduler sees the whole block at once.
    h_scr[...] = lax.fori_loop(0, n_steps, step, h_scr[...], unroll=True)


@functools.partial(jax.jit, static_argnames=("t_blk",))
def rnn_forward(x, w_hh, b_hh, w_xh, b_xh, h0, *, t_blk=8):
    """x: (T,B,I); w_hh: (H,H); b_hh: (H,); w_xh: (H,I); b_xh: (H,); h0: (1,B,H)."""
    T, B, I = x.shape
    H = w_hh.shape[0]

    # --- Hoisted, fully parallel input projection (plain XLA) -------------
    # P_t = x_t @ W_xh^T + b_xh + b_hh   for all timesteps at once.
    p = jnp.einsum(
        "tbi,hi->tbh",
        x.astype(jnp.float32),
        w_xh.astype(jnp.float32),
        preferred_element_type=jnp.float32,
    )
    p = p + (b_xh + b_hh).astype(jnp.float32).reshape(1, 1, H)

    # --- Block the time axis ----------------------------------------------
    t_blk = min(t_blk, T)
    n_blk = pl.cdiv(T, t_blk)
    t_pad = n_blk * t_blk
    if t_pad != T:
        # Padded steps compute garbage hidden states that get sliced off below.
        p = jnp.pad(p, ((0, t_pad - T), (0, 0), (0, 0)))

    whh_t = w_hh.T.astype(jnp.float32)   # (H, H)

    h_seq = pl.pallas_call(
        rnn_recurrence_kernel,
        out_shape=jax.ShapeDtypeStruct((t_pad, B, H), x.dtype),
        grid_spec=pltpu.PrefetchScalarGridSpec(
            num_scalar_prefetch=0,
            grid=(n_blk,),
            in_specs=[
                pl.BlockSpec((t_blk, B, H), lambda b: (b, 0, 0)),  # P block
                pl.BlockSpec((1, B, H), lambda b: (0, 0, 0)),      # h0
                pl.BlockSpec((H, H), lambda b: (0, 0)),            # W_hh^T
            ],
            out_specs=pl.BlockSpec((t_blk, B, H), lambda b: (b, 0, 0)),
            scratch_shapes=[pltpu.VMEM((B, H), jnp.float32)],
        ),
        compiler_params=pltpu.CompilerParams(
            dimension_semantics=("arbitrary",),  # sequential recurrence
        ),
    )(p, h0, whh_t)

    h_seq = h_seq[:T]
    h_last = h_seq[T - 1:T]
    return h_seq, h_last


def rnn_reference(x, w_hh, b_hh, w_xh, b_xh, h0):
    """Pure-JAX reference mirroring the PyTorch loop."""
    def step(h, xt):
        h_new = jnp.tanh(h @ w_hh.T + b_hh + xt @ w_xh.T + b_xh)
        return h_new, h_new
    h_fin, h_seq = jax.lax.scan(step, h0[0], x)
    return h_seq, h_fin[None]


if __name__ == "__main__":
    # Shapes consistent with the module: input_size=1, hidden_size=20.
    # seq_len=10 with t_blk=4 exercises both the multi-block carry and the
    # padded final block.
    seq_len, batch, input_size, hidden_size = 10, 2, 1, 20

    key = jax.random.PRNGKey(0)
    kx, k1, k2, k3, k4 = jax.random.split(key, 5)

    # Deterministic parameter init (PyTorch nn.Linear-style uniform bounds).
    bound_hh = 1.0 / jnp.sqrt(hidden_size)
    bound_xh = 1.0 / jnp.sqrt(input_size)
    w_hh = jax.random.uniform(k1, (hidden_size, hidden_size), jnp.float32,
                              -bound_hh, bound_hh)
    b_hh = jax.random.uniform(k2, (hidden_size,), jnp.float32,
                              -bound_hh, bound_hh)
    w_xh = jax.random.uniform(k3, (hidden_size, input_size), jnp.float32,
                              -bound_xh, bound_xh)
    b_xh = jax.random.uniform(k4, (hidden_size,), jnp.float32,
                              -bound_xh, bound_xh)

    x = jax.random.normal(kx, (seq_len, batch, input_size), jnp.float32)
    h0 = jnp.zeros((1, batch, hidden_size), jnp.float32)  # default h=None path

    h_seq, h_last = rnn_forward(x, w_hh, b_hh, w_xh, b_xh, h0, t_blk=4)
    jax.block_until_ready((h_seq, h_last))

    h_seq_ref, h_last_ref = rnn_reference(x, w_hh, b_hh, w_xh, b_xh, h0)
    assert h_seq.shape == (seq_len, batch, hidden_size)
    assert h_last.shape == (1, batch, hidden_size)
    assert jnp.allclose(h_seq, h_seq_ref, atol=1e-5, rtol=1e-5)
    assert jnp.allclose(h_last, h_last_ref, atol=1e-5, rtol=1e-5)

    # TODO(synk): PackedSequence input / pack_outputs path (variable lengths)
    # has no clean Pallas equivalent; only the dense-tensor forward is implemented.
    # TODO(synk): 'relu' activation variant would swap jnp.tanh -> jnp.maximum(., 0).
    print("KERNEL_OK")
</pallas_src>

<mosaic_0001>
module attributes {stable_mosaic.version = 11 : i64} {
  func.func @rnn_recurrence_kernel(%arg0: i32, %arg1: memref<4x2x20xf32, #tpu.memory_space<vmem>>, %arg2: memref<1x2x20xf32, #tpu.memory_space<vmem>>, %arg3: memref<20x20xf32, #tpu.memory_space<vmem>>, %arg4: memref<4x2x20xf32, #tpu.memory_space<vmem>>, %arg5: memref<2x20xf32, #tpu.memory_space<vmem>>) attributes {dimension_semantics = [#tpu.dimension_semantics<arbitrary>], iteration_bounds = array<i64: 3>, scalar_prefetch = 0 : i64, scratch_operands = 1 : i64, tpu.core_type = #tpu.core_type<tc>, window_params = [{transform_indices = @transform_0, window_bounds = array<i64: 4, 2, 20>}, {pipeline_mode = #tpu.pipeline_mode<synchronous>, transform_indices = @transform_1, window_bounds = array<i64: 1, 2, 20>}, {pipeline_mode = #tpu.pipeline_mode<synchronous>, transform_indices = @transform_2, window_bounds = array<i64: 20, 20>}, {transform_indices = @transform_3, window_bounds = array<i64: 4, 2, 20>}]} {
    %c0_i32 = arith.constant 0 : i32
    %0 = arith.cmpi eq, %arg0, %c0_i32 : i32
    %1 = arith.extui %0 : i1 to i32
    %c0_i32_0 = arith.constant 0 : i32
    %2 = arith.cmpi ne, %1, %c0_i32_0 : i32
    scf.if %2 {
      %c0_26 = arith.constant 0 : index
      %c0_27 = arith.constant 0 : index
      %c0_28 = arith.constant 0 : index
      %46 = vector.load %arg2[%c0_26, %c0_27, %c0_28] : memref<1x2x20xf32, #tpu.memory_space<vmem>>, vector<1x2x20xf32>
      %47 = vector.shape_cast %46 : vector<1x2x20xf32> to vector<2x20xf32>
      %c0_29 = arith.constant 0 : index
      %c0_30 = arith.constant 0 : index
      %48 = vector.load %arg5[%c0_29, %c0_30] : memref<2x20xf32, #tpu.memory_space<vmem>>, vector<2x20xf32>
      tpu.vector_store %arg5[%c0_29, %c0_30], %47 {strides = array<i32>} : memref<2x20xf32, #tpu.memory_space<vmem>>, vector<2x20xf32>,
    } else {
    }
    %c0 = arith.constant 0 : index
    %c0_1 = arith.constant 0 : index
    %3 = vector.load %arg3[%c0, %c0_1] : memref<20x20xf32, #tpu.memory_space<vmem>>, vector<20x20xf32>
    %c0_2 = arith.constant 0 : index
    %c0_3 = arith.constant 0 : index
    %4 = vector.load %arg5[%c0_2, %c0_3] : memref<2x20xf32, #tpu.memory_space<vmem>>, vector<2x20xf32>
    %c0_i32_4 = arith.constant 0 : i32
    %cst = arith.constant dense<0.000000e+00> : vector<2x20xf32>
    %5 = tpu.matmul %4, %3, %cst {dimension_numbers = #tpu.dot_dimension_numbers<[1], [0], [0], [1], [0, 0, 1, 1], [], []>} : vector<2x20xf32>, vector<20x20xf32>, vector<2x20xf32> -> vector<2x20xf32>
    %6 = arith.index_cast %c0_i32_4 : i32 to index
    %c0_5 = arith.constant 0 : index
    %c0_6 = arith.constant 0 : index
    %7 = vector.load %arg1[%6, %c0_5, %c0_6] : memref<4x2x20xf32, #tpu.memory_space<vmem>>, vector<1x2x20xf32>
    %8 = vector.shape_cast %7 : vector<1x2x20xf32> to vector<2x20xf32>
    %9 = arith.addf %5, %8 : vector<2x20xf32>
    %10 = math.tanh %9 : vector<2x20xf32>
    %11 = arith.index_cast %c0_i32_4 : i32 to index
    %c0_7 = arith.constant 0 : index
    %c0_8 = arith.constant 0 : index
    %12 = vector.load %arg4[%11, %c0_7, %c0_8] : memref<4x2x20xf32, #tpu.memory_space<vmem>>, vector<1x2x20xf32>
    %13 = vector.shape_cast %12 : vector<1x2x20xf32> to vector<2x20xf32>
    %14 = vector.shape_cast %10 : vector<2x20xf32> to vector<1x2x20xf32>
    tpu.vector_store %arg4[%11, %c0_7, %c0_8], %14 {strides = array<i32>} : memref<4x2x20xf32, #tpu.memory_space<vmem>>, vector<1x2x20xf32>,
    %c1_i32 = arith.constant 1 : i32
    %cst_9 = arith.constant dense<0.000000e+00> : vector<2x20xf32>
    %15 = tpu.matmul %10, %3, %cst_9 {dimension_numbers = #tpu.dot_dimension_numbers<[1], [0], [0], [1], [0, 0, 1, 1], [], []>} : vector<2x20xf32>, vector<20x20xf32>, vector<2x20xf32> -> vector<2x20xf32>
    %16 = arith.index_cast %c1_i32 : i32 to index
    %c0_10 = arith.constant 0 : index
    %c0_11 = arith.constant 0 : index
    %17 = vector.load %arg1[%16, %c0_10, %c0_11] : memref<4x2x20xf32, #tpu.memory_space<vmem>>, vector<1x2x20xf32>
    %18 = vector.shape_cast %17 : vector<1x2x20xf32> to vector<2x20xf32>
    %19 = arith.addf %15, %18 : vector<2x20xf32>
    %20 = math.tanh %19 : vector<2x20xf32>
    %21 = arith.index_cast %c1_i32 : i32 to index
    %c0_12 = arith.constant 0 : index
    %c0_13 = arith.constant 0 : index
    %22 = vector.load %arg4[%21, %c0_12, %c0_13] : memref<4x2x20xf32, #tpu.memory_space<vmem>>, vector<1x2x20xf32>
    %23 = vector.shape_cast %22 : vector<1x2x20xf32> to vector<2x20xf32>
    %24 = vector.shape_cast %20 : vector<2x20xf32> to vector<1x2x20xf32>
    tpu.vector_store %arg4[%21, %c0_12, %c0_13], %24 {strides = array<i32>} : memref<4x2x20xf32, #tpu.memory_space<vmem>>, vector<1x2x20xf32>,
    %c2_i32 = arith.constant 2 : i32
    %cst_14 = arith.constant dense<0.000000e+00> : vector<2x20xf32>
    %25 = tpu.matmul %20, %3, %cst_14 {dimension_numbers = #tpu.dot_dimension_numbers<[1], [0], [0], [1], [0, 0, 1, 1], [], []>} : vector<2x20xf32>, vector<20x20xf32>, vector<2x20xf32> -> vector<2x20xf32>
    %26 = arith.index_cast %c2_i32 : i32 to index
    %c0_15 = arith.constant 0 : index
    %c0_16 = arith.constant 0 : index
    %27 = vector.load %arg1[%26, %c0_15, %c0_16] : memref<4x2x20xf32, #tpu.memory_space<vmem>>, vector<1x2x20xf32>
    %28 = vector.shape_cast %27 : vector<1x2x20xf32> to vector<2x20xf32>
    %29 = arith.addf %25, %28 : vector<2x20xf32>
    %30 = math.tanh %29 : vector<2x20xf32>
    %31 = arith.index_cast %c2_i32 : i32 to index
    %c0_17 = arith.constant 0 : index
    %c0_18 = arith.constant 0 : index
    %32 = vector.load %arg4[%31, %c0_17, %c0_18] : memref<4x2x20xf32, #tpu.memory_space<vmem>>, vector<1x2x20xf32>
    %33 = vector.shape_cast %32 : vector<1x2x20xf32> to vector<2x20xf32>
    %34 = vector.shape_cast %30 : vector<2x20xf32> to vector<1x2x20xf32>
    tpu.vector_store %arg4[%31, %c0_17, %c0_18], %34 {strides = array<i32>} : memref<4x2x20xf32, #tpu.memory_space<vmem>>, vector<1x2x20xf32>,
    %c3_i32 = arith.constant 3 : i32
    %cst_19 = arith.constant dense<0.000000e+00> : vector<2x20xf32>
    %35 = tpu.matmul %30, %3, %cst_19 {dimension_numbers = #tpu.dot_dimension_numbers<[1], [0], [0], [1], [0, 0, 1, 1], [], []>} : vector<2x20xf32>, vector<20x20xf32>, vector<2x20xf32> -> vector<2x20xf32>
    %36 = arith.index_cast %c3_i32 : i32 to index
    %c0_20 = arith.constant 0 : index
    %c0_21 = arith.constant 0 : index
    %37 = vector.load %arg1[%36, %c0_20, %c0_21] : memref<4x2x20xf32, #tpu.memory_space<vmem>>, vector<1x2x20xf32>
    %38 = vector.shape_cast %37 : vector<1x2x20xf32> to vector<2x20xf32>
    %39 = arith.addf %35, %38 : vector<2x20xf32>
    %40 = math.tanh %39 : vector<2x20xf32>
    %41 = arith.index_cast %c3_i32 : i32 to index
    %c0_22 = arith.constant 0 : index
    %c0_23 = arith.constant 0 : index
    %42 = vector.load %arg4[%41, %c0_22, %c0_23] : memref<4x2x20xf32, #tpu.memory_space<vmem>>, vector<1x2x20xf32>
    %43 = vector.shape_cast %42 : vector<1x2x20xf32> to vector<2x20xf32>
    %44 = vector.shape_cast %40 : vector<2x20xf32> to vector<1x2x20xf32>
    tpu.vector_store %arg4[%41, %c0_22, %c0_23], %44 {strides = array<i32>} : memref<4x2x20xf32, #tpu.memory_space<vmem>>, vector<1x2x20xf32>,
    %c4_i32 = arith.constant 4 : i32
    %c0_24 = arith.constant 0 : index
    %c0_25 = arith.constant 0 : index
    %45 = vector.load %arg5[%c0_24, %c0_25] : memref<2x20xf32, #tpu.memory_space<vmem>>, vector<2x20xf32>
    tpu.vector_store %arg5[%c0_24, %c0_25], %40 {strides = array<i32>} : memref<2x20xf32, #tpu.memory_space<vmem>>, vector<2x20xf32>,
    return
  }
  func.func @transform_0(%arg0: i32) -> (i32, i32, i32) {
    %c0_i32 = arith.constant 0 : i32
    %c0_i32_0 = arith.constant 0 : i32
    %c0_i32_1 = arith.constant 0 : i32
    return %arg0, %c0_i32, %c0_i32_0 : i32, i32, i32
  }
  func.func @transform_1(%arg0: i32) -> (i32, i32, i32) {
    %c0_i32 = arith.constant 0 : i32
    %c0_i32_0 = arith.constant 0 : i32
    %c0_i32_1 = arith.constant 0 : i32
    %c0_i32_2 = arith.constant 0 : i32
    return %c0_i32, %c0_i32_0, %c0_i32_1 : i32, i32, i32
  }
  func.func @transform_2(%arg0: i32) -> (i32, i32) {
    %c0_i32 = arith.constant 0 : i32
    %c0_i32_0 = arith.constant 0 : i32
    %c0_i32_1 = arith.constant 0 : i32
    return %c0_i32, %c0_i32_0 : i32, i32
  }
  func.func @transform_3(%arg0: i32) -> (i32, i32, i32) {
    %c0_i32 = arith.constant 0 : i32
    %c0_i32_0 = arith.constant 0 : i32
    %c0_i32_1 = arith.constant 0 : i32
    return %arg0, %c0_i32, %c0_i32_0 : i32, i32, i32
  }
}

</mosaic_0001>

<bundles_post_ra>
// kernel: rnn_forward.1
= control target key start
LH: loop header
LB: loop body
LE: loop exit
PB: predicated region body
PF: predicated region fallthrough
CT: control target
= control target key end

     0   :  { %s698_s12 = smov 0   ;;  %s756_s0 = inlined_call_operand.vmem [shape: f32[12,2,20], index: 0, kind: input, shape index: {}]   ;;  %s757_s1 = inlined_call_operand.vmem [shape: f32[1,2,20], index: 1, kind: input, shape index: {}]   ;;  %s758_s2 = inlined_call_operand.vmem [shape: f32[20,20], index: 2, kind: input, shape index: {}]   ;;  %s759_s3 = inlined_call_operand.vmem [shape: f32[12,2,20], index: 3, kind: output, shape index: {}]  }
   0x1 LB: > { %s558_s13 = sadd.s32 4294967295, %s673_s12   ;;  %p562_p0 = scmp.ge.s32.totalorder %s673_s12, 1  ;;  %s673_s12 = sphi %s698_s12, %s13_s12  }
   0x2   : > { %p138_p1 = scmp.lt.s32.totalorder %s673_s12, 4 }
   0x4   : > { %p139_p2 = pnand %p562_p0, %p138_p1 }
   0x5   : > { %s563_s14 = sshll.u32 (!%p139_p2), %s558_s13, 2  ;;  %p567_p4 = scmp.ne.s32.totalorder (!%p139_p2), %s558_s13, 0 }
   0x6   : > { %142 = sbr.rel (%p139_p2) target bundleno = 929 (0x3a1), region = 32  ;;  %p163_p3 = scmp.lt.s32.totalorder (!%p139_p2), %s563_s14, 11 }
   0xd   : > { %s761_s14 = smov (!%p163_p3, %s563_s14), 11  ;;  %177 = sbr.rel (%p567_p4) target bundleno = 20 (0x14), region = 36 }
   0xe   : > { %s564_s15 = sshll.u32 %s761_s14, 1  ;;  %v178_v0 = vld [vmem:[%s757_s1] sm:$0x3] (!%p567_p4)  ;;  %vm179_vm0 = vcmask (!%p567_p4), 156672  }
   0xf   : > { %s709_s18 = scalar_lea.vmem %s756_s0, %s564_s15  ;;  %s714_s21 = scalar_lea.vmem %s759_s3, %s564_s15  ;;  %180 = vst.msk [vmem:[#allocation2] sm:$0x3] (!%p567_p4), %vm179_vm0, %v178_v0 }
  0x14 PF: > { %v181_v1 = vld [vmem:[%s758_s2] sm:$0xff]  ;;  %v182_v2 = vld [vmem:[%s758_s2 + $0x8] sm:$0xff]  ;;  %v675_v3 = vmov 0.0|0.0   ;;  %vm676_vm1 = vmmov 0   ;;  %v677_v5 = vmov 0.0   ;;  %vm190_vm2 = vcmask 1043456  }
  0x15   : > { %636 = vmatprep.subr.bf16.mxu0 %v675_v3  ;;  %v637_v4 = vpack.c.bf16 %v182_v2, %v181_v1  ;;  %639 = vmatprep.subr.bf16.mxu1 %v675_v3  ;;  %v183_v6 = vld [vmem:[%s758_s2 + $0x10] sm:$0xf]  ;;  %vm186_vm3 = vcmask 162816   ;;  %v185_v8 = vld [vmem:[%s709_s18] sm:$0x3]  ;;  %vm265_vm4 = vcmask 156672  }
  0x16   : > { %606 = vmatprep.mubr.msk.f32.mxu0 %vm676_vm1, %v677_v5  ;;  %615 = vmatprep.mubr.msk.f32.mxu1 %vm676_vm1, %v677_v5  ;;  %v184_v7 = vld [vmem:[#allocation2] sm:$0x3]  ;;  %v570_v13 = vld [vmem:[%s709_s18 + $0x2] sm:$0x3]  ;;  %v574_v18 = vld [vmem:[%s709_s18 + $0x4] sm:$0x3] }
  0x17   : > { %638 = vmatpush3.bf16.msra.mxu0 %v637_v4  ;;  %641 = vmatpush3.bf16.msra.mxu1 %v637_v4  ;;  %v578_v23 = vld [vmem:[%s709_s18 + $0x6] sm:$0x3] }
  0x18   : > { %604 = vmatprep.subr.mxu0 %v677_v5  ;;  %613 = vmatprep.subr.mxu1 %v677_v5 }
  0x1b   : > { %605 = vmatpush3.msk.msra.mxu0 %vm190_vm2, %v183_v6  ;;  %614 = vmatpush3.msk.msra.mxu1 %vm190_vm2, %v183_v6 }
  0x1c   : > { %607 = vmatmul.mubr.msk.f32.vlgmr.msra.gmra.mrb[0].mxu0 %vm186_vm3, %v184_v7  ;;  %642 = vmatprep.subr.bf16.mxu0 %v675_v3 }
  0x1d   : > { %644 = vmatpush3.bf16.msra.mxu0 %v637_v4  ;;  %624 = vmatprep.mubr.msk.f32.mxu0 %vm676_vm1, %v677_v5 }
  0x1e   : > { %622 = vmatprep.subr.mxu0 %v677_v5  ;;  %645 = vmatprep.subr.bf16.mxu1 %v675_v3 }
  0x21   : > { %623 = vmatpush3.msk.msra.mxu0 %vm190_vm2, %v183_v6 }
  0xef   : > { %v260_v9 = vpop.f32.mrb[0].mxu0 }
  0xf0   : > { %v261_v10 = vadd.f32 %v260_v9, %v185_v8  ;;  %v608_v11 = vpop.f32.mrb[1].mxu0 }
  0xf2   : > { %659 = vtanh.f32 %v261_v10 }
  0xfc   : > { %v660_v12 = vpop.eup %659 }
  0xfd   : > { %266 = vst.msk [vmem:[%s714_s21] sm:$0x3] %vm265_vm4, %v660_v12  ;;  %616 = vmatmul.mubr.msk.f32.vlgmr.msra.gmra.mrb[0].mxu1 %vm186_vm3, %v660_v12 }
  0xfe   : > { %647 = vmatpush3.bf16.msra.mxu1 %v637_v4  ;;  %633 = vmatprep.mubr.msk.f32.mxu1 %vm676_vm1, %v677_v5 }
  0xff   : > { %631 = vmatprep.subr.mxu1 %v677_v5 }
 0x102   : > { %632 = vmatpush3.msk.msra.mxu1 %vm190_vm2, %v183_v6 }
 0x1d0   : > { %v338_v14 = vpop.f32.mrb[0].mxu1 }
 0x1d1   : > { %v339_v15 = vadd.f32 %v570_v13, %v338_v14  ;;  %v617_v16 = vpop.f32.mrb[1].mxu1 }
 0x1d3   : > { %661 = vtanh.f32 %v339_v15 }
 0x1dd   : > { %v662_v17 = vpop.eup %661 }
 0x1de   : > { %573 = vst.msk [vmem:[%s714_s21 + $0x2] sm:$0x3] %vm265_vm4, %v662_v17  ;;  %625 = vmatmul.mubr.msk.f32.vlgmr.msra.gmra.mrb[2].mxu0 %vm186_vm3, %v662_v17 }
 0x2b1   : > { %v416_v19 = vpop.f32.mrb[2].mxu0 }
 0x2b2   : > { %v417_v20 = vadd.f32 %v574_v18, %v416_v19  ;;  %v626_v21 = vpop.f32.mrb[3].mxu0 }
 0x2b4   : > { %663 = vtanh.f32 %v417_v20 }
 0x2be   : > { %v664_v22 = vpop.eup %663 }
 0x2bf   : > { %577 = vst.msk [vmem:[%s714_s21 + $0x4] sm:$0x3] %vm265_vm4, %v664_v22  ;;  %634 = vmatmul.mubr.msk.f32.vlgmr.msra.gmra.mrb[2].mxu1 %vm186_vm3, %v664_v22 }
 0x392   : > { %v494_v24 = vpop.f32.mrb[2].mxu1 }
 0x393   : > { %v495_v25 = vadd.f32 %v578_v23, %v494_v24  ;;  %v635_v26 = vpop.f32.mrb[3].mxu1 }
 0x395   : > { %665 = vtanh.f32 %v495_v25 }
 0x39f   : > { %v666_v27 = vpop.eup %665 }
 0x3a0   : > { %581 = vst.msk [vmem:[%s714_s21 + $0x6] sm:$0x3] %vm265_vm4, %v666_v27  ;;  %501 = vst.msk [vmem:[#allocation2] sm:$0x3] %vm265_vm4, %v666_v27 }
 0x3a1 PF: > { %s13_s12 = sadd.s32 1, %s673_s12  }
 0x3a2   : > { %p10_p5 = scmp.ge.s32.totalorder %s13_s12, 5  }
 0x3a4   :  { %12 = sbr.rel (!%p10_p5) target bundleno = 1 (0x1), region = 72 }

</bundles_post_ra>
